<compile_context>
chip_gen: v7x
topology: tpu7x:2x2x1
jax: 0.10.0
libtpu: 0.0.40
codegen_flags: <defaults>
</compile_context>

<pallas_src>
import functools
import math

import jax
import jax.numpy as jnp
from jax.experimental import pallas as pl
from jax.experimental.pallas import tpu as pltpu


def _layernorm_kernel(alpha_ref, bias_ref, x_ref, o_ref, *, eps, inv_n, inv_nm1,
                      groups, hidden):
    """x_ref/o_ref: (TILE_ROWS, groups*hidden) VMEM blocks; alpha/bias: (1,) SMEM."""
    alpha = alpha_ref[0]
    bias = bias_ref[0]

    if groups == 1:
        # Plain path: H on lanes.  Two reduction passes + one store pass;
        # (x - mean) is recomputed in the store pass so no tile-sized f32
        # temporary is carried between passes.
        x = x_ref[...].astype(jnp.float32)
        mean = jnp.sum(x, axis=-1, keepdims=True) * inv_n
        d = x_ref[...].astype(jnp.float32) - mean
        var = jnp.sum(d * d, axis=-1, keepdims=True) * inv_nm1
        scale = alpha * pl.reciprocal(eps + jnp.sqrt(var), approx=False)
        o_ref[...] = ((x_ref[...].astype(jnp.float32) - mean) * scale
                      + bias).astype(o_ref.dtype)
    else:
        # Small-H fold: each 128-lane row holds `groups` logical rows of
        # length `hidden`; reduce per group on a (T, groups, hidden) view so
        # loads/stores stay lane-dense (full-width vst).
        t = x_ref.shape[0]
        xg = x_ref[...].astype(jnp.float32).reshape(t, groups, hidden)
        mean = jnp.sum(xg, axis=-1, keepdims=True) * inv_n
        d = xg - mean
        var = jnp.sum(d * d, axis=-1, keepdims=True) * inv_nm1
        scale = alpha * pl.reciprocal(eps + jnp.sqrt(var), approx=False)
        o_ref[...] = (d * scale + bias).reshape(t, groups * hidden).astype(o_ref.dtype)


def _choose_tile_rows(rows, width, itemsize, target_bytes):
    """Row tile ~target bytes per input block, dtype-aware sublane multiple,
    >=2 grid steps when possible, prefer an even step count (v7x: 2 TCs)."""
    sub = max(8, 32 // itemsize)          # 8 rows f32 / 16 bf16 / 32 int8-fp8
    row_bytes = max(1, width * itemsize)
    tile = max(sub, (target_bytes // row_bytes) // sub * sub)
    rows_up = pl.cdiv(rows, sub) * sub
    tile = min(tile, rows_up)
    # At least 2 grid steps so the DMA pipeline overlaps (blocks stay big).
    if rows_up > sub and pl.cdiv(rows, tile) < 2:
        tile = max(sub, (rows_up // 2) // sub * sub)
    # Prefer an even step count so both v7x TensorCores stay balanced.
    steps = pl.cdiv(rows, tile)
    if steps > 2 and steps % 2 == 1:
        cand = max(sub, min(tile, pl.cdiv(pl.cdiv(rows, steps + 1), sub) * sub))
        if pl.cdiv(rows, cand) % 2 == 0:
            tile = cand
    return int(tile)


def _plan_tiling(rows, width, itemsize, explicit_tile_rows=None):
    """Pick (tile_rows, vmem_limit_bytes) for this chip generation."""
    vmem_cap = None
    try:
        vmem_cap = int(pltpu.get_tpu_info().vmem_capacity_bytes)
    except Exception:
        pass
    ceiling = max((vmem_cap - (8 << 20)) if vmem_cap else (100 << 20), 32 << 20)
    # v7x-class (<=64 MiB VMEM, ~3.2 TB/s HBM): 8 MiB blocks amortize the
    # ~0.35us per-grid-step overhead; v5e/v6e are already at the knee at 4 MiB.
    target = (8 << 20) if (vmem_cap is not None and vmem_cap <= (64 << 20)) else (4 << 20)
    # Budget per input byte: 2x in + 2x out (double-buffered, itemsize each)
    # + ~2 f32 working blocks; keep that plus margin under the ceiling.
    bytes_per_in_byte = (4 * itemsize + 8) / itemsize
    target = max(1 << 20, min(target, int((ceiling - (4 << 20)) / bytes_per_in_byte)))

    if explicit_tile_rows is None:
        tile_rows = _choose_tile_rows(rows, width, itemsize, target)
    else:
        tile_rows = int(explicit_tile_rows)

    need = tile_rows * width * (4 * itemsize + 8) + (4 << 20)
    vmem_limit = int(min(max(need, 32 << 20), ceiling))
    return tile_rows, vmem_limit


def _pallas_layernorm_2d(x2, alpha, bias, *, eps, hidden, groups, tile_rows,
                         vmem_limit):
    rows2, width = x2.shape
    inv_n = 1.0 / hidden
    inv_nm1 = 1.0 / max(hidden - 1, 1)   # hidden == 1 guarded (torch.std -> NaN)
    kernel = functools.partial(
        _layernorm_kernel, eps=float(eps), inv_n=inv_n, inv_nm1=inv_nm1,
        groups=groups, hidden=hidden)
    return pl.pallas_call(
        kernel,
        out_shape=jax.ShapeDtypeStruct((rows2, width), x2.dtype),
        grid_spec=pltpu.PrefetchScalarGridSpec(
            num_scalar_prefetch=0,
            grid=(pl.cdiv(rows2, tile_rows),),
            in_specs=[
                pl.BlockSpec(memory_space=pltpu.MemorySpace.SMEM),  # alpha (1,)
                pl.BlockSpec(memory_space=pltpu.MemorySpace.SMEM),  # bias  (1,)
                pl.BlockSpec((tile_rows, width), lambda i: (i, 0)),
            ],
            out_specs=pl.BlockSpec((tile_rows, width), lambda i: (i, 0)),
        ),
        compiler_params=pltpu.CompilerParams(
            dimension_semantics=("parallel",),
            vmem_limit_bytes=vmem_limit,
        ),
    )(alpha, bias, x2)


_FOLD_SUPPORTED = None


def _small_h_fold_supported():
    """Probe once whether the lane-splitting (T, g, H) view lowers (and is
    numerically exact) on this Mosaic build; otherwise use the plain path."""
    global _FOLD_SUPPORTED
    if _FOLD_SUPPORTED is None:
        try:
            h, g = 32, 4
            xt = jax.random.normal(jax.random.PRNGKey(1), (8, g * h), jnp.float32)
            a = jnp.ones((1,), jnp.float32)
            b = jnp.zeros((1,), jnp.float32)
            got = _pallas_layernorm_2d(xt, a, b, eps=1e-6, hidden=h, groups=g,
                                       tile_rows=8, vmem_limit=32 << 20)
            got = jax.block_until_ready(got)
            xr = xt.reshape(-1, h)
            mean = jnp.mean(xr, axis=-1, keepdims=True)
            std = jnp.std(xr, axis=-1, keepdims=True, ddof=1)
            ref = ((xr - mean) / (1e-6 + std)).reshape(8, g * h)
            _FOLD_SUPPORTED = bool(jnp.allclose(got, ref, atol=1e-5, rtol=1e-5))
        except Exception:
            _FOLD_SUPPORTED = False
    return _FOLD_SUPPORTED


def layer_normalization(x, alpha, bias, *, eps=1e-6, tile_rows=None):
    """x: (..., H) float array; alpha, bias: shape (1,) parameters."""
    orig_shape = x.shape
    hidden = int(orig_shape[-1])
    rows = int(math.prod(orig_shape[:-1]))

    # Lane-dense fold for small H: pack g = 128 // H logical rows per 128-lane
    # row (pure-metadata reshape; reshape back at the end is also free).
    groups = 1
    if 1 < hidden < 128 and 128 % hidden == 0:
        g = 128 // hidden
        if g > 1 and rows % g == 0 and _small_h_fold_supported():
            groups = g

    width = groups * hidden
    rows2 = rows // groups
    x2 = x.reshape(rows2, width)

    tile_rows, vmem_limit = _plan_tiling(rows2, width, x2.dtype.itemsize, tile_rows)

    out = _pallas_layernorm_2d(x2, alpha, bias, eps=eps, hidden=hidden,
                               groups=groups, tile_rows=tile_rows,
                               vmem_limit=vmem_limit)
    return out.reshape(orig_shape)


if __name__ == "__main__":
    key = jax.random.PRNGKey(0)
    batch, seq, hidden = 2, 8, 32
    x = jax.random.normal(key, (batch, seq, hidden), dtype=jnp.float32)

    # Parameters exactly as in the PyTorch module __init__.
    alpha = jnp.ones((1,), dtype=jnp.float32)   # nn.Parameter(torch.ones(1))
    bias = jnp.zeros((1,), dtype=jnp.float32)   # nn.Parameter(torch.zeros(1))
    eps = 1e-6

    out = layer_normalization(x, alpha, bias, eps=eps)
    out = jax.block_until_ready(out)

    # Reference in plain JAX (torch.std is unbiased, eps added to std).
    mean = jnp.mean(x, axis=-1, keepdims=True)
    std = jnp.std(x, axis=-1, keepdims=True, ddof=1)
    ref = alpha[0] * (x - mean) / (eps + std) + bias[0]

    assert out.shape == x.shape and out.dtype == x.dtype
    assert jnp.allclose(out, ref, atol=1e-5, rtol=1e-5), (
        float(jnp.max(jnp.abs(out - ref)))
    )
    print("KERNEL_OK")
</pallas_src>

<mosaic_0001>
module attributes {stable_mosaic.version = 11 : i64} {
  func.func @_layernorm_kernel(%arg0: i32, %arg1: memref<1xf32, #tpu.memory_space<smem>>, %arg2: memref<1xf32, #tpu.memory_space<smem>>, %arg3: memref<8x128xf32, #tpu.memory_space<vmem>>, %arg4: memref<8x128xf32, #tpu.memory_space<vmem>>) attributes {dimension_semantics = [#tpu.dimension_semantics<parallel>], iteration_bounds = array<i64: 1>, scalar_prefetch = 0 : i64, scratch_operands = 0 : i64, tpu.core_type = #tpu.core_type<tc>, window_params = [{transform_indices = @transform_0, window_bounds = array<i64: 1>}, {transform_indices = @transform_1, window_bounds = array<i64: 1>}, {transform_indices = @transform_2, window_bounds = array<i64: 8, 128>}, {transform_indices = @transform_3, window_bounds = array<i64: 8, 128>}]} {
    %c0 = arith.constant 0 : index
    %0 = memref.load %arg1[%c0] : memref<1xf32, #tpu.memory_space<smem>>
    %c0_0 = arith.constant 0 : index
    %1 = memref.load %arg2[%c0_0] : memref<1xf32, #tpu.memory_space<smem>>
    %c0_1 = arith.constant 0 : index
    %c0_2 = arith.constant 0 : index
    %2 = vector.load %arg3[%c0_1, %c0_2] : memref<8x128xf32, #tpu.memory_space<vmem>>, vector<8x128xf32>
    %3 = vector.shape_cast %2 : vector<8x128xf32> to vector<8x4x32xf32>
    %cst = arith.constant dense<0.000000e+00> : vector<8x4xf32>
    %4 = vector.multi_reduction <add>, %3, %cst [2] : vector<8x4x32xf32> to vector<8x4xf32>
    %5 = vector.shape_cast %4 : vector<8x4xf32> to vector<8x4x1xf32>
    %cst_3 = arith.constant 3.125000e-02 : f32
    %6 = vector.broadcast %cst_3 : f32 to vector<8x4x1xf32>
    %7 = arith.mulf %5, %6 : vector<8x4x1xf32>
    %8 = vector.broadcast %7 : vector<8x4x1xf32> to vector<8x4x32xf32>
    %9 = arith.subf %3, %8 : vector<8x4x32xf32>
    %10 = arith.mulf %9, %9 : vector<8x4x32xf32>
    %cst_4 = arith.constant dense<0.000000e+00> : vector<8x4xf32>
    %11 = vector.multi_reduction <add>, %10, %cst_4 [2] : vector<8x4x32xf32> to vector<8x4xf32>
    %12 = vector.shape_cast %11 : vector<8x4xf32> to vector<8x4x1xf32>
    %cst_5 = arith.constant 0.0322580636 : f32
    %13 = vector.broadcast %cst_5 : f32 to vector<8x4x1xf32>
    %14 = arith.mulf %12, %13 : vector<8x4x1xf32>
    %15 = math.sqrt %14 : vector<8x4x1xf32>
    %cst_6 = arith.constant 9.99999997E-7 : f32
    %16 = vector.broadcast %cst_6 : f32 to vector<8x4x1xf32>
    %17 = arith.addf %16, %15 : vector<8x4x1xf32>
    %18 = tpu.reciprocal %17 : vector<8x4x1xf32> -> vector<8x4x1xf32>
    %19 = vector.broadcast %0 : f32 to vector<8x4x1xf32>
    %20 = arith.mulf %19, %18 : vector<8x4x1xf32>
    %21 = vector.broadcast %20 : vector<8x4x1xf32> to vector<8x4x32xf32>
    %22 = arith.mulf %9, %21 : vector<8x4x32xf32>
    %23 = vector.broadcast %1 : f32 to vector<8x4x32xf32>
    %24 = arith.addf %22, %23 : vector<8x4x32xf32>
    %25 = vector.shape_cast %24 : vector<8x4x32xf32> to vector<8x128xf32>
    %c0_7 = arith.constant 0 : index
    %c0_8 = arith.constant 0 : index
    %26 = vector.load %arg4[%c0_7, %c0_8] : memref<8x128xf32, #tpu.memory_space<vmem>>, vector<8x128xf32>
    tpu.vector_store %arg4[%c0_7, %c0_8], %25 {strides = array<i32>} : memref<8x128xf32, #tpu.memory_space<vmem>>, vector<8x128xf32>,
    return
  }
  func.func @transform_0(%arg0: i32) -> i32 {
    %c0_i32 = arith.constant 0 : i32
    %c0_i32_0 = arith.constant 0 : i32
    return %c0_i32 : i32
  }
  func.func @transform_1(%arg0: i32) -> i32 {
    %c0_i32 = arith.constant 0 : i32
    %c0_i32_0 = arith.constant 0 : i32
    return %c0_i32 : i32
  }
  func.func @transform_2(%arg0: i32) -> (i32, i32) {
    %c0_i32 = arith.constant 0 : i32
    %c0_i32_0 = arith.constant 0 : i32
    return %arg0, %c0_i32 : i32, i32
  }
  func.func @transform_3(%arg0: i32) -> (i32, i32) {
    %c0_i32 = arith.constant 0 : i32
    %c0_i32_0 = arith.constant 0 : i32
    return %arg0, %c0_i32 : i32, i32
  }
}

module attributes {stable_mosaic.version = 11 : i64} {
  func.func @_layernorm_kernel(%arg0: i32, %arg1: memref<1xf32, #tpu.memory_space<smem>>, %arg2: memref<1xf32, #tpu.memory_space<smem>>, %arg3: memref<8x32xf32, #tpu.memory_space<vmem>>, %arg4: memref<8x32xf32, #tpu.memory_space<vmem>>) attributes {dimension_semantics = [#tpu.dimension_semantics<parallel>], iteration_bounds = array<i64: 2>, scalar_prefetch = 0 : i64, scratch_operands = 0 : i64, tpu.core_type = #tpu.core_type<tc>, window_params = [{transform_indices = @transform_0, window_bounds = array<i64: 1>}, {transform_indices = @transform_1, window_bounds = array<i64: 1>}, {transform_indices = @transform_2, window_bounds = array<i64: 8, 32>}, {transform_indices = @transform_3, window_bounds = array<i64: 8, 32>}]} {
    %c0 = arith.constant 0 : index
    %0 = memref.load %arg1[%c0] : memref<1xf32, #tpu.memory_space<smem>>
    %c0_0 = arith.constant 0 : index
    %1 = memref.load %arg2[%c0_0] : memref<1xf32, #tpu.memory_space<smem>>
    %c0_1 = arith.constant 0 : index
    %c0_2 = arith.constant 0 : index
    %2 = vector.load %arg3[%c0_1, %c0_2] : memref<8x32xf32, #tpu.memory_space<vmem>>, vector<8x32xf32>
    %cst = arith.constant dense<0.000000e+00> : vector<8xf32>
    %3 = vector.multi_reduction <add>, %2, %cst [1] : vector<8x32xf32> to vector<8xf32>
    %4 = vector.shape_cast %3 : vector<8xf32> to vector<8x1xf32>
    %cst_3 = arith.constant 3.125000e-02 : f32
    %5 = vector.broadcast %cst_3 : f32 to vector<8x1xf32>
    %6 = arith.mulf %4, %5 : vector<8x1xf32>
    %c0_4 = arith.constant 0 : index
    %c0_5 = arith.constant 0 : index
    %7 = vector.load %arg3[%c0_4, %c0_5] : memref<8x32xf32, #tpu.memory_space<vmem>>, vector<8x32xf32>
    %8 = vector.broadcast %6 : vector<8x1xf32> to vector<8x32xf32>
    %9 = arith.subf %7, %8 : vector<8x32xf32>
    %10 = arith.mulf %9, %9 : vector<8x32xf32>
    %cst_6 = arith.constant dense<0.000000e+00> : vector<8xf32>
    %11 = vector.multi_reduction <add>, %10, %cst_6 [1] : vector<8x32xf32> to vector<8xf32>
    %12 = vector.shape_cast %11 : vector<8xf32> to vector<8x1xf32>
    %cst_7 = arith.constant 0.0322580636 : f32
    %13 = vector.broadcast %cst_7 : f32 to vector<8x1xf32>
    %14 = arith.mulf %12, %13 : vector<8x1xf32>
    %15 = math.sqrt %14 : vector<8x1xf32>
    %cst_8 = arith.constant 9.99999997E-7 : f32
    %16 = vector.broadcast %cst_8 : f32 to vector<8x1xf32>
    %17 = arith.addf %16, %15 : vector<8x1xf32>
    %18 = tpu.reciprocal %17 : vector<8x1xf32> -> vector<8x1xf32>
    %19 = vector.broadcast %0 : f32 to vector<8x1xf32>
    %20 = arith.mulf %19, %18 : vector<8x1xf32>
    %c0_9 = arith.constant 0 : index
    %c0_10 = arith.constant 0 : index
    %21 = vector.load %arg3[%c0_9, %c0_10] : memref<8x32xf32, #tpu.memory_space<vmem>>, vector<8x32xf32>
    %22 = vector.broadcast %6 : vector<8x1xf32> to vector<8x32xf32>
    %23 = arith.subf %21, %22 : vector<8x32xf32>
    %24 = vector.broadcast %20 : vector<8x1xf32> to vector<8x32xf32>
    %25 = arith.mulf %23, %24 : vector<8x32xf32>
    %26 = vector.broadcast %1 : f32 to vector<8x32xf32>
    %27 = arith.addf %25, %26 : vector<8x32xf32>
    %c0_11 = arith.constant 0 : index
    %c0_12 = arith.constant 0 : index
    %28 = vector.load %arg4[%c0_11, %c0_12] : memref<8x32xf32, #tpu.memory_space<vmem>>, vector<8x32xf32>
    tpu.vector_store %arg4[%c0_11, %c0_12], %27 {strides = array<i32>} : memref<8x32xf32, #tpu.memory_space<vmem>>, vector<8x32xf32>,
    return
  }
  func.func @transform_0(%arg0: i32) -> i32 {
    %c0_i32 = arith.constant 0 : i32
    %c0_i32_0 = arith.constant 0 : i32
    return %c0_i32 : i32
  }
  func.func @transform_1(%arg0: i32) -> i32 {
    %c0_i32 = arith.constant 0 : i32
    %c0_i32_0 = arith.constant 0 : i32
    return %c0_i32 : i32
  }
  func.func @transform_2(%arg0: i32) -> (i32, i32) {
    %c0_i32 = arith.constant 0 : i32
    %c0_i32_0 = arith.constant 0 : i32
    return %arg0, %c0_i32 : i32, i32
  }
  func.func @transform_3(%arg0: i32) -> (i32, i32) {
    %c0_i32 = arith.constant 0 : i32
    %c0_i32_0 = arith.constant 0 : i32
    return %arg0, %c0_i32 : i32, i32
  }
}

</mosaic_0001>

<bundles_post_ra>
// kernel: tpu_custom_call.1
= control target key start
LH: loop header
LB: loop body
LE: loop exit
PB: predicated region body
PF: predicated region fallthrough
CT: control target
= control target key end

     0   :  { %10 = vsyncpa [#allocation5], 0  ;;  %s627_s0 = inlined_call_operand.<no memory space> [shape: f32[1], index: 0, kind: input, shape index: {}]   ;;  %s628_s1 = inlined_call_operand.<no memory space> [shape: f32[1], index: 1, kind: input, shape index: {}]   ;;  %s629_s2 = inlined_call_operand.hbm [shape: f32[8,128], index: 2, kind: input, shape index: {}]   ;;  %s630_s3 = inlined_call_operand.hbm [shape: f32[8,128], index: 3, kind: output, shape index: {}]  }
   0x1   :  { %11 = vsyncpa [#allocation6], 0  ;;  %s479_s12 = smov [#allocation4]   ;;  %s431_s16 = scalar_lea.hbm %s629_s2, 128 }
   0x2   :  { %s22_s13 = sshll.u32 %s479_s12, 4  ;;  %p432_p0 = scmp.ne.s32.totalorder %s629_s2, %s431_s16  ;;  %s23_s13 = int_to_ptr.vmem [resolvable:$true] %s22_s13 }
   0x3   :  { %p435_p1 = scmp.lt.u32.totalorder %s431_s16, %s629_s2 }
   0x5   :  { %p437_p2 = pnand %p435_p1, %p432_p0 }
   0x7   :  { %440 = shalt.err (!%p437_p2)
}
   0x8   :  { %s441_s21 = scalar_lea.vmem %s23_s13, 128  ;;  %p446_p4 = scmp.lt.s32.totalorder %s23_s13, %s23_s13 }
   0x9   :  { %p442_p3 = scmp.ne.s32.totalorder %s23_s13, %s441_s21  ;;  %p447_p5 = scmp.lt.s32.totalorder %s441_s21, %s441_s21 }
   0xb   :  { %p448_p6 = por %p447_p5, %p446_p4 }
   0xd   :  { %p449_p7 = pnand %p448_p6, %p442_p3 }
   0xf   :  { %452 = shalt.err (!%p449_p7)
}
  0x10   :  { %25 = dma.hbm_to_vmem [thread:$0]  %s629_s2, 128, %s23_s13, [#allocation5]  }
  0x11   :  { %475 = dma.done.wait [#allocation5], 128  }
  0x12   :  { %476 = vsyncadd [#allocation5], 4294967168  ;;  %v31_v0 = vld [vmem:[#allocation4] sm:$0xff]  ;;  %s480_s24 = smov 32   ;;  %s481_s25 = smov 96   ;;  %v47_v3 = vlaneseq  ;;  %vm110_vm0 = vcmask 257024  }
  0x13   :  { %39 = vrot.lane.b32.xlu1 %v31_v0, %s480_s24  ;;  %33 = vrot.lane.b32.xlu0 %v31_v0, %s481_s25  ;;  %s482_s26 = smov 64   ;;  %v483_v1 = vmov 1983009808   ;;  %v484_v4 = vmov 1934713408   ;;  %v485_v31 = vmov 0.0  }
  0x14   :  { %v45_v2 = vunpack.c.l.s4 %v483_v1  ;;  %v77_v5 = vunpack.c.l.s4 %v484_v4  ;;  %v48_v7 = vshrl.u32 %v47_v3, 7 }
  0x16   :  { %v46_v6 = vunpack.c.0.s8 %v45_v2  ;;  %v78_v10 = vunpack.c.0.s8 %v77_v5 }
  0x17   :  { %36 = vrot.lane.b32.xlu0 %v31_v0, %s482_s26 }
  0x18   :  { %v522_v11 = vsub.s32 %v46_v6, %v48_v7  ;;  %v524_v17 = vsub.s32 %v78_v10, %v48_v7 }
  0x85   :  { %v40_v8 = vpop.permute.xlu1 %39  ;;  %v34_v9 = vpop.permute.xlu0 %33 }
  0x86   :  { %v58_v12 = vcombine.low %v34_v9, %v40_v8  ;;  %v59_v13 = vcombine.high %v34_v9, %v40_v8 }
  0x88   :  { %v66_v18 = vrot.slane %v58_v12, %v522_v11  ;;  %v73_v19 = vrot.slane %v59_v13, %v522_v11 }
  0x89   :  { %v37_v14 = vpop.permute.xlu0 %36 }
  0x8a   :  { %v42_v15 = vcombine.low %v31_v0, %v37_v14  ;;  %v43_v16 = vcombine.high %v31_v0, %v37_v14 }
  0x8c   :  { %v50_v20 = vrot.slane %v42_v15, %v522_v11  ;;  %v57_v21 = vrot.slane %v43_v16, %v522_v11 }
  0x8e   :  { %v74_v22 = vcombine.low %v50_v20, %v66_v18  ;;  %v75_v23 = vcombine.high %v50_v20, %v66_v18  ;;  %v90_v24 = vcombine.low %v57_v21, %v73_v19  ;;  %v91_v27 = vcombine.high %v57_v21, %v73_v19 }
  0x90   :  { %v89_v25 = vrot.slane %v75_v23, %v524_v17  ;;  %v82_v26 = vrot.slane %v74_v22, %v524_v17  ;;  %v98_v30 = vrot.slane %v90_v24, %v524_v17  ;;  %v105_v33 = vrot.slane %v91_v27, %v524_v17 }
  0x92   :  { %v117_v28 = vsel %vm110_vm0, %v89_v25, 0.0  ;;  %v111_v29 = vsel %vm110_vm0, %v82_v26, 0.0  ;;  %v107_v32 = vcombine.high %v89_v25, %v485_v31  ;;  %v123_v34 = vsel %vm110_vm0, %v98_v30, 0.0 }
  0x93   :  { %118 = vadd.xlane.f32.xlu0 %v117_v28  ;;  %112 = vadd.xlane.f32.xlu1 %v111_v29  ;;  %v108_v36 = vcombine.high %v98_v30, %v485_v31  ;;  %v106_v37 = vcombine.high %v82_v26, %v485_v31  ;;  %v109_v40 = vcombine.high %v105_v33, %v485_v31  ;;  %v129_v42 = vsel %vm110_vm0, %v105_v33, 0.0 }
  0x94   :  { %v120_v35 = vsel %vm110_vm0, %v107_v32, 0.0 }
  0x95   :  { %v126_v38 = vsel %vm110_vm0, %v108_v36, 0.0  ;;  %v114_v39 = vsel %vm110_vm0, %v106_v37, 0.0  ;;  %v132_v41 = vsel %vm110_vm0, %v109_v40, 0.0 }
  0x97   :  { %124 = vadd.xlane.f32.xlu0 %v123_v34  ;;  %121 = vadd.xlane.f32.xlu1 %v120_v35 }
  0x9b   :  { %127 = vadd.xlane.f32.xlu1 %v126_v38  ;;  %115 = vadd.xlane.f32.xlu0 %v114_v39 }
  0x9f   :  { %133 = vadd.xlane.f32.xlu1 %v132_v41  ;;  %130 = vadd.xlane.f32.xlu0 %v129_v42 }
 0x120   :  { %v119_v43 = vpop.xlane.xlu0 %118  ;;  %v113_v44 = vpop.xlane.xlu1 %112 }
 0x121   :  { %v137_v45 = vmul.f32 0.03125, %v119_v43  ;;  %v135_v46 = vmul.f32 0.03125, %v113_v44 }
 0x123   :  { %v542_v47 = vsub.f32 %v89_v25, %v137_v45  ;;  %v544_v48 = vsub.f32 %v82_v26, %v135_v46 }
 0x124   :  { %v125_v49 = vpop.xlane.xlu0 %124  ;;  %v122_v50 = vpop.xlane.xlu1 %121 }
 0x125   :  { %v139_v51 = vmul.f32 0.03125, %v125_v49  ;;  %v151_v52 = vmul.f32 %v544_v48, %v544_v48  ;;  %v138_v53 = vmul.f32 0.03125, %v122_v50  ;;  %v153_v56 = vmul.f32 %v542_v47, %v542_v47 }
 0x127   :  { %v548_v54 = vsub.f32 %v98_v30, %v139_v51  ;;  %v159_v55 = vsel %vm110_vm0, %v151_v52, 0.0  ;;  %v553_v60 = vsub.f32 %v107_v32, %v138_v53  ;;  %v165_v63 = vsel %vm110_vm0, %v153_v56, 0.0 }
 0x128   :  { %v128_v57 = vpop.xlane.xlu1 %127  ;;  %160 = vadd.xlane.f32.xlu0 %v159_v55  ;;  %v116_v58 = vpop.xlane.xlu0 %115 }
 0x129   :  { %v136_v59 = vmul.f32 0.03125, %v116_v58  ;;  %v140_v61 = vmul.f32 0.03125, %v128_v57  ;;  %v155_v0 = vmul.f32 %v548_v54, %v548_v54  ;;  %v154_v6 = vmul.f32 %v553_v60, %v553_v60 }
 0x12b   :  { %v555_v62 = vsub.f32 %v106_v37, %v136_v59  ;;  %v562_v5 = vsub.f32 %v108_v36, %v140_v61  ;;  %v171_v9 = vsel %vm110_vm0, %v155_v0, 0.0  ;;  %v168_v14 = vsel %vm110_vm0, %v154_v6, 0.0 }
 0x12c   :  { %v134_v1 = vpop.xlane.xlu1 %133  ;;  %166 = vadd.xlane.f32.xlu0 %v165_v63  ;;  %v131_v2 = vpop.xlane.xlu0 %130 }
 0x12d   :  { %v141_v3 = vmul.f32 0.03125, %v131_v2  ;;  %v152_v4 = vmul.f32 %v555_v62, %v555_v62  ;;  %v142_v7 = vmul.f32 0.03125, %v134_v1  ;;  %v156_v16 = vmul.f32 %v562_v5, %v562_v5 }
 0x12f   :  { %v566_v8 = vsub.f32 %v105_v33, %v141_v3  ;;  %v162_v10 = vsel %vm110_vm0, %v152_v4, 0.0  ;;  %v572_v13 = vsub.f32 %v109_v40, %v142_v7  ;;  %v174_v18 = vsel %vm110_vm0, %v156_v16, 0.0 }
 0x130   :  { %172 = vadd.xlane.f32.xlu0 %v171_v9  ;;  %163 = vadd.xlane.f32.xlu1 %v162_v10 }
 0x131   :  { %v157_v12 = vmul.f32 %v566_v8, %v566_v8  ;;  %v158_v19 = vmul.f32 %v572_v13, %v572_v13 }
 0x133   :  { %v177_v15 = vsel %vm110_vm0, %v157_v12, 0.0  ;;  %v180_v20 = vsel %vm110_vm0, %v158_v19, 0.0 }
 0x134   :  { %169 = vadd.xlane.f32.xlu1 %v168_v14  ;;  %178 = vadd.xlane.f32.xlu0 %v177_v15 }
 0x138   :  { %175 = vadd.xlane.f32.xlu1 %v174_v18 }
 0x13c   :  { %181 = vadd.xlane.f32.xlu1 %v180_v20 }
 0x1b5   :  { %v161_v21 = vpop.xlane.xlu0 %160 }
 0x1b6   :  { %v183_v22 = vmul.f32 0.032258064, %v161_v21 }
 0x1b8   :  { %399 = vrsqrt.f32 %v183_v22  ;;  %vm193_vm1 = vcmp.eq.f32.partialorder %v183_v22, inf  ;;  %v196_v41 = vand.u32 2147483648, %v183_v22  ;;  %vm195_vm4 = vcmp.eq.f32.partialorder %v183_v22, 0.0 }
 0x1b9   :  { %v167_v23 = vpop.xlane.xlu0 %166 }
 0x1ba   :  { %v185_v24 = vmul.f32 0.032258064, %v167_v23 }
 0x1bc   :  { %401 = vrsqrt.f32 %v185_v24  ;;  %vm207_vm2 = vcmp.eq.f32.partialorder %v185_v24, inf  ;;  %v210_v40 = vand.u32 2147483648, %v185_v24  ;;  %vm209_vm3 = vcmp.eq.f32.partialorder %v185_v24, 0.0 }
 0x1bd   :  { %v164_v25 = vpop.xlane.xlu1 %163  ;;  %v173_v26 = vpop.xlane.xlu0 %172 }
 0x1be   :  { %v184_v27 = vmul.f32 0.032258064, %v164_v25  ;;  %v187_v28 = vmul.f32 0.032258064, %v173_v26 }
 0x1c0   :  { %403 = vrsqrt.f32 %v184_v27  ;;  %vm200_vm5 = vcmp.eq.f32.partialorder %v184_v27, inf  ;;  %vm202_vm6 = vcmp.eq.f32.partialorder %v184_v27, 0.0  ;;  %v203_v53 = vand.u32 2147483648, %v184_v27 }
 0x1c1   :  { %405 = vrsqrt.f32 %v187_v28  ;;  %v170_v29 = vpop.xlane.xlu1 %169  ;;  %v179_v30 = vpop.xlane.xlu0 %178  ;;  %vm221_vm7 = vcmp.eq.f32.partialorder %v187_v28, inf  ;;  %vm223_vm8 = vcmp.eq.f32.partialorder %v187_v28, 0.0  ;;  %v224_v57 = vand.u32 2147483648, %v187_v28 }
 0x1c2   :  { %v400_v31 = vpop.eup %399  ;;  %v186_v32 = vmul.f32 0.032258064, %v170_v29  ;;  %v189_v33 = vmul.f32 0.032258064, %v179_v30 }
 0x1c3   :  { %v192_v34 = vmul.f32 %v400_v31, %v183_v22 }
 0x1c4   :  { %407 = vrsqrt.f32 %v186_v32  ;;  %vm214_vm9 = vcmp.eq.f32.partialorder %v186_v32, inf  ;;  %vm216_vm10 = vcmp.eq.f32.partialorder %v186_v32, 0.0  ;;  %v217_v6 = vand.u32 2147483648, %v186_v32 }
 0x1c5   :  { %409 = vrsqrt.f32 %v189_v33  ;;  %v176_v35 = vpop.xlane.xlu1 %175  ;;  %v194_v39 = vsel %vm193_vm1, %v183_v22, %v192_v34  ;;  %vm235_vm11 = vcmp.eq.f32.partialorder %v189_v33, inf  ;;  %v238_v10 = vand.u32 2147483648, %v189_v33 }
 0x1c6   :  { %v402_v36 = vpop.eup %401  ;;  %v582_v37 = vmul.f32 0.032258064, %v176_v35  ;;  %v197_v50 = vsel %vm195_vm4, %v196_v41, %v194_v39  ;;  %vm237_vm12 = vcmp.eq.f32.partialorder %v189_v33, 0.0  ;;  %v263_v34 = vstv %s627_s0 }
 0x1c7   :  { %v206_v38 = vmul.f32 %v402_v36, %v185_v24  ;;  %v247_v59 = vadd.f32 1e-06, %v197_v50  ;;  %vm369_vm1 = vcmask 261120  }
 0x1c8   :  { %411 = vrsqrt.f32 %v582_v37  ;;  %vm228_vm13 = vcmp.eq.f32.partialorder %v582_v37, inf  ;;  %v231_v21 = vand.u32 2147483648, %v582_v37  ;;  %vm230_vm14 = vcmp.eq.f32.partialorder %v582_v37, 0.0 }
 0x1c9   :  { %v208_v42 = vsel %vm207_vm2, %v185_v24, %v206_v38  ;;  %v182_v43 = vpop.xlane.xlu1 %181  ;;  %vm371_vm2 = vcmask 523264  }
 0x1ca   :  { %v404_v44 = vpop.eup %403  ;;  %v211_v45 = vsel %vm209_vm3, %v210_v40, %v208_v42  ;;  %v190_v46 = vmul.f32 0.032258064, %v182_v43  ;;  %vm373_vm3 = vcmask 785408  }
 0x1cb   :  { %v406_v49 = vpop.eup %405  ;;  %v199_v51 = vmul.f32 %v404_v44, %v184_v27  ;;  %v249_v52 = vadd.f32 1e-06, %v211_v45 }
 0x1cc   :  { %v220_v55 = vmul.f32 %v406_v49, %v187_v28  ;;  %413 = vrsqrt.f32 %v190_v46  ;;  %vm242_vm15 = vcmp.eq.f32.partialorder %v190_v46, inf  ;;  %vm244_vm0 = vcmp.eq.f32.partialorder %v190_v46, 0.0 }
 0x1cd   :  { %v201_v56 = vsel %vm200_vm5, %v184_v27, %v199_v51  ;;  %415 = vrcp.f32 %v249_v52  ;;  %v245_v27 = vand.u32 2147483648, %v190_v46  ;;  %v280_v51 = vstv %s628_s1  ;;  %s486_s1 = smov [#allocation7]  }
 0x1ce   :  { %v408_v58 = vpop.eup %407  ;;  %v204_v61 = vsel %vm202_vm6, %v203_v53, %v201_v56  ;;  %v222_v63 = vsel %vm221_vm7, %v187_v28, %v220_v55  ;;  %s382_s29 = sshll.u32 %s486_s1, 4  ;;  %s383_s29 = int_to_ptr.vmem [resolvable:$true] %s382_s29 }
 0x1cf   :  { %v410_v0 = vpop.eup %409  ;;  %v248_v1 = vadd.f32 1e-06, %v204_v61  ;;  %v225_v2 = vsel %vm223_vm8, %v224_v57, %v222_v63  ;;  %v213_v3 = vmul.f32 %v408_v58, %v186_v32  ;;  %s453_s30 = scalar_lea.vmem %s383_s29, 128  ;;  %p458_p9 = scmp.lt.s32.totalorder %s383_s29, %s383_s29 }
 0x1d0   :  { %v251_v4 = vadd.f32 1e-06, %v225_v2  ;;  %v234_v7 = vmul.f32 %v410_v0, %v189_v33  ;;  %p454_p8 = scmp.ne.s32.totalorder %s383_s29, %s453_s30  ;;  %p459_p10 = scmp.lt.s32.totalorder %s453_s30, %s453_s30 }
 0x1d1   :  { %417 = vrcp.f32 %v248_v1  ;;  %v215_v9 = vsel %vm214_vm9, %v186_v32, %v213_v3 }
 0x1d2   :  { %v412_v12 = vpop.eup %411  ;;  %419 = vrcp.f32 %v247_v59  ;;  %v218_v14 = vsel %vm216_vm10, %v217_v6, %v215_v9  ;;  %v236_v15 = vsel %vm235_vm11, %v189_v33, %v234_v7  ;;  %p460_p11 = por %p459_p10, %p458_p9 }
 0x1d3   :  { %v250_v16 = vadd.f32 1e-06, %v218_v14  ;;  %v239_v18 = vsel %vm237_vm12, %v238_v10, %v236_v15  ;;  %v227_v19 = vmul.f32 %v412_v12, %v582_v37  ;;  %421 = vrcp.f32 %v251_v4 }
 0x1d4   :  { %v253_v20 = vadd.f32 1e-06, %v239_v18  ;;  %p461_p12 = pnand %p460_p11, %p454_p8 }
 0x1d5   :  { %423 = vrcp.f32 %v250_v16  ;;  %v229_v22 = vsel %vm228_vm13, %v582_v37, %v227_v19 }
 0x1d6   :  { %v414_v23 = vpop.eup %413  ;;  %425 = vrcp.f32 %v253_v20  ;;  %v232_v24 = vsel %vm230_vm14, %v231_v21, %v229_v22 }
 0x1d7   :  { %v252_v25 = vadd.f32 1e-06, %v232_v24  ;;  %v241_v26 = vmul.f32 %v414_v23, %v190_v46  ;;  %v416_v29 = vpop.eup %415 }
 0x1d8   :  { %v266_v37 = vmul.f32 %v416_v29, %v263_v34 }
 0x1d9   :  { %427 = vrcp.f32 %v252_v25  ;;  %v243_v28 = vsel %vm242_vm15, %v190_v46, %v241_v26 }
 0x1da   :  { %v246_v30 = vsel %vm244_vm0, %v245_v27, %v243_v28  ;;  %v274_v45 = vmul.f32 %v266_v37, %v542_v47 }
 0x1db   :  { %v418_v31 = vpop.eup %417  ;;  %v254_v32 = vadd.f32 1e-06, %v246_v30 }
 0x1dc   :  { %v420_v33 = vpop.eup %419  ;;  %v265_v36 = vmul.f32 %v418_v31, %v263_v34  ;;  %v283_v58 = vadd.f32 %v280_v51, %v274_v45 }
 0x1dd   :  { %429 = vrcp.f32 %v254_v32  ;;  %v422_v35 = vpop.eup %421  ;;  %v264_v39 = vmul.f32 %v420_v33, %v263_v34 }
 0x1de   :  { %v268_v43 = vmul.f32 %v422_v35, %v263_v34  ;;  %v273_v44 = vmul.f32 %v265_v36, %v555_v62 }
 0x1df   :  { %v424_v38 = vpop.eup %423  ;;  %v272_v50 = vmul.f32 %v264_v39, %v544_v48 }
 0x1e0   :  { %v426_v40 = vpop.eup %425  ;;  %v267_v41 = vmul.f32 %v424_v38, %v263_v34  ;;  %v276_v56 = vmul.f32 %v268_v43, %v548_v54  ;;  %v282_v57 = vadd.f32 %v280_v51, %v273_v44 }
 0x1e1   :  { %v270_v42 = vmul.f32 %v426_v40, %v263_v34  ;;  %v281_v59 = vadd.f32 %v280_v51, %v272_v50 }
 0x1e2   :  { %v275_v46 = vmul.f32 %v267_v41, %v553_v60  ;;  %v285_v0 = vadd.f32 %v280_v51, %v276_v56 }
 0x1e3   :  { %v428_v49 = vpop.eup %427  ;;  %v278_v53 = vmul.f32 %v270_v42, %v566_v8  ;;  %v289_v1 = vcombine.low %v281_v59, %v283_v58 }
 0x1e4   :  { %v269_v52 = vmul.f32 %v428_v49, %v263_v34  ;;  %v284_v55 = vadd.f32 %v280_v51, %v275_v46 }
 0x1e5   :  { %v287_v61 = vadd.f32 %v280_v51, %v278_v53  ;;  %v296_v54 = vrot.slane %v289_v1, %v522_v11 }
 0x1e6   :  { %v277_v60 = vmul.f32 %v269_v52, %v562_v5  ;;  %v297_v63 = vcombine.low %v282_v57, %v284_v55 }
 0x1e7   :  { %v430_v62 = vpop.eup %429  ;;  %v305_v4 = vcombine.low %v285_v0, %v287_v61 }
 0x1e8   :  { %v271_v47 = vmul.f32 %v430_v62, %v263_v34  ;;  %v286_v2 = vadd.f32 %v280_v51, %v277_v60  ;;  %v304_v8 = vrot.slane %v297_v63, %v522_v11 }
 0x1e9   :  { %v312_v7 = vrot.slane %v305_v4, %v522_v11 }
 0x1ea   :  { %v279_v48 = vmul.f32 %v271_v47, %v572_v13  ;;  %v322_v10 = vcombine.high %v296_v54, %v304_v8  ;;  %v321_v5 = vcombine.low %v296_v54, %v304_v8 }
 0x1ec   :  { %v288_v3 = vadd.f32 %v280_v51, %v279_v48  ;;  %v336_v13 = vrot.slane %v322_v10, %v524_v17  ;;  %v329_v16 = vrot.slane %v321_v5, %v524_v17 }
 0x1ee   :  { %v313_v6 = vcombine.low %v286_v2, %v288_v3 }
 0x1f0   :  { %v320_v9 = vrot.slane %v313_v6, %v522_v11 }
 0x1f2   :  { %v338_v12 = vcombine.high %v312_v7, %v320_v9  ;;  %v337_v14 = vcombine.low %v312_v7, %v320_v9 }
 0x1f4   :  { %v352_v15 = vrot.slane %v338_v12, %v524_v17  ;;  %v345_v18 = vrot.slane %v337_v14, %v524_v17 }
 0x1f6   :  { %v355_v19 = vcombine.low %v336_v13, %v352_v15  ;;  %v354_v20 = vcombine.high %v329_v16, %v345_v18  ;;  %v353_v21 = vcombine.low %v329_v16, %v345_v18  ;;  %v356_v11 = vcombine.high %v336_v13, %v352_v15 }
 0x1f8   :  { %362 = vrot.lane.b32.xlu1 %v355_v19, %s482_s26  ;;  %358 = vrot.lane.b32.xlu0 %v354_v20, %s480_s24 }
 0x1fc   :  { %366 = vrot.lane.b32.xlu1 %v356_v11, %s481_s25 }
 0x26a   :  { %v363_v22 = vpop.permute.xlu1 %362  ;;  %v359_v23 = vpop.permute.xlu0 %358 }
 0x26b   :  { %v370_v24 = vsel %vm369_vm1, %v353_v21, %v359_v23 }
 0x26c   :  { %v372_v17 = vsel %vm371_vm2, %v370_v24, %v363_v22 }
 0x26e   :  { %v367_v25 = vpop.permute.xlu1 %366 }
 0x26f   :  { %v374_v26 = vsel %vm373_vm3, %v372_v17, %v367_v25 }
 0x270   :  { %375 = vst [vmem:[#allocation7] sm:$0xff] %v374_v26 }
 0x271   :  { %464 = shalt.err (!%p461_p12)
}
 0x272   :  { %s465_s6 = scalar_lea.hbm %s630_s3, 128 }
 0x273   :  { %p466_p13 = scmp.ne.s32.totalorder %s630_s3, %s465_s6  ;;  %p469_p0 = scmp.lt.u32.totalorder %s465_s6, %s630_s3 }
 0x275   :  { %p471_p1 = pnand %p469_p0, %p466_p13 }
 0x277   :  { %474 = shalt.err (!%p471_p1)
}
 0x278   :  { %385 = dma.vmem_to_hbm [thread:$0]  %s383_s29, 128, %s630_s3, [#allocation6]  }
 0x279   :  { %477 = dma.done.wait [#allocation6], 128  }
 0x27a   :  { %478 = vsyncadd [#allocation6], 4294967168 }
 0x27b   :  { %389 = vsyncpa [#allocation5], 1 }
 0x27c   :  { %390 = vsyncpa [#allocation6], 1 }

// kernel: tpu_custom_call.1
= control target key start
LH: loop header
LB: loop body
LE: loop exit
PB: predicated region body
PF: predicated region fallthrough
CT: control target
= control target key end

     0   :  { %s657_s0 = inlined_call_operand.<no memory space> [shape: f32[1], index: 0, kind: input, shape index: {}]   ;;  %s658_s1 = inlined_call_operand.<no memory space> [shape: f32[1], index: 1, kind: input, shape index: {}]   ;;  %s659_s2 = inlined_call_operand.hbm [shape: f32[16,32], index: 2, kind: input, shape index: {}]   ;;  %s660_s3 = inlined_call_operand.hbm [shape: f32[16,32], index: 3, kind: output, shape index: {}]  }
   0x1   :  { %8 = sst [smem:[#allocation2]] %s657_s0 }
   0x2   :  { %9 = sst [smem:[#allocation3]] %s658_s1 }
   0x3   :  { %10 = vsyncpa [#allocation5], 0 }
   0x4   :  { %12 = vsyncpa [#allocation5 + $0x1], 0 }
   0x5   :  { %13 = vsyncpa [#allocation6], 0 }
   0x6   :  { %15 = vsyncpa [#allocation6 + $0x1], 0  ;;  %s489_s16 = smov 0   ;;  %s491_s17 = smov 0  }
   0x7   :  { %s493_s18 = smov 0   ;;  %s495_s19 = smov 0  }
   0x8 LB: > { %s510_s0 = sadd.s32 4294967295, %s459_s19   ;;  %s301_s1 = sadd.s32 4294967294, %s459_s19   ;;  %s459_s19 = sphi %s495_s19, %s675_s19   ;;  %s455_s18 = sphi %s493_s18, %s674_s18   ;;  %s451_s17 = sphi %s491_s17, %s673_s17   ;;  %s447_s16 = sphi %s489_s16, %s672_s16  }
   0x9   : > { %s514_s20 = sadd.s32 1, %s459_s19   ;;  %s70_s21 = sadd.s32 1, %s455_s18 }
   0xa   : > { %s67_s22 = ssub.s32 %s459_s19, %s514_s20  ;;  %p77_p0 = scmp.ne.s32.totalorder %s455_s18, %s451_s17 }
   0xb   : > { %p68_p1 = scmp.eq.s32.totalorder %s67_s22, 0  ;;  %p78_p2 = scmp.eq.s32.totalorder %s459_s19, 0 }
   0xc   : > { %p83_p3 = scmp.ne.s32.totalorder %s451_s17, %s447_s16  ;;  %p84_p4 = scmp.eq.s32.totalorder %s510_s0, 0 }
   0xd   : > { %s526_s23 = scalar_select %p68_p1, %s455_s18, %s70_s21  }
   0xe   : > { %p528_p5 = por %p78_p2, %p77_p0  ;;  %p532_p6 = por %p84_p4, %p83_p3 }
   0xf   : > { %p107_p7 = scmp.eq.s32.totalorder %s510_s0, 1  ;;  %p113_p8 = scmp.eq.s32.totalorder %s301_s1, 1 }
  0x10   : > { %p325_p10 = scmp.lt.s32.totalorder %s459_s19, 2  ;;  %s139_s28 = sand.u32 1, %s455_s18  }
  0x11   : > { %p539_p11 = por %p107_p7, %p77_p0  ;;  %p543_p12 = por %p113_p8, %p83_p3 }
  0x12   : > { %s305_s29 = sshll.u32 %s459_s19, 7  ;;  %s304_s30 = sshll.u32 %s139_s28, 3 }
  0x13   : > { %s664_s26 = scalar_select %p539_p11, 1, 0 }
  0x14   : > { %s665_s27 = scalar_select %p543_p12, 1, 0 }
  0x15   : > { %s552_s6 = scalar_lea.hbm %s659_s2, %s305_s29  ;;  %s143_s7 = scalar_lea.vmem [#allocation4], %s304_s30 }
  0x16   : > { %s150_s8 = sshll.u32 %s143_s7, 4  ;;  %p556_p13 = pnand %p325_p10, %p528_p5  ;;  %s560_s8 = int_to_ptr.vmem [resolvable:$true] %s150_s8 }
  0x17   : > { %s140_s10 = scalar_lea.sflag [#allocation5], %s139_s28  ;;  %s363_s11 = scalar_lea.hbm %s552_s6, 128 }
  0x18   : > { %p364_p2 = scmp.ne.s32.totalorder %s552_s6, %s363_s11  ;;  %p365_p3 = pneg %p556_p13 }
  0x19   : > { %s368_s14 = scalar_lea.hbm %s659_s2, 256  ;;  %p369_p5 = scmp.lt.u32.totalorder %s552_s6, %s659_s2 }
  0x1a   : > { %p366_p4 = pnand %p365_p3, %p364_p2  ;;  %p370_p8 = scmp.lt.u32.totalorder %s368_s14, %s363_s11 }
  0x1b   : > { %p372_p9 = scmp.lt.u32.totalorder %s363_s11, %s552_s6 }
  0x1c   : > { %p367_p7 = pneg %p366_p4  ;;  %p371_p10 = por %p370_p8, %p369_p5 }
  0x1e   : > { %p373_p0 = por %p372_p9, %p371_p10 }
  0x20   : > { %p374_p1 = pnand %p373_p0, %p367_p7 }
  0x22   : > { %377 = shalt.err (!%p374_p1)
}
  0x23   : > { %s378_s21 = scalar_lea.vmem %s560_s8, 128  ;;  %s461_s22 = smov [#allocation4]  }
  0x24   : > { %p379_p2 = scmp.ne.s32.totalorder %s560_s8, %s378_s21  ;;  %s383_s24 = sshll.u32 %s461_s22, 4  ;;  %s384_s24 = int_to_ptr.vmem [resolvable:$false] %s383_s24 }
  0x25   : > { %s385_s28 = scalar_lea.vmem %s384_s24, 256  ;;  %p386_p11 = scmp.lt.s32.totalorder %s560_s8, %s384_s24 }
  0x26   : > { %p381_p4 = pnand %p379_p2, %p365_p3  ;;  %p387_p5 = scmp.lt.s32.totalorder %s385_s28, %s378_s21 }
  0x28   : > { %p382_p12 = pneg %p381_p4  ;;  %p388_p8 = por %p387_p5, %p386_p11 }
  0x2a   : > { %p389_p9 = pnand %p388_p8, %p382_p12 }
  0x2c   : > { %392 = shalt.err (!%p389_p9)
}
  0x2d   : > { %320 = dma.hbm_to_vmem [thread:$0]  (!%p556_p13), %s552_s6, 128, %s560_s8, %s140_s10  }
  0x2e   : > { %p667_p0 = scmp.lt.s32.totalorder %s459_s19, 3  ;;  %p668_p1 = scmp.ge.s32.totalorder %s459_s19, 1 }
  0x30   : > { %p156_p3 = pnand %p668_p1, %p667_p0 }
  0x31   : > { %s594_s29 = sand.u32 (!%p156_p3), 1, %s451_s17  }
  0x32   : > { %159 = sbr.rel (%p156_p3) target bundleno = 401 (0x191), region = 32  ;;  %s307_s30 = sshll.u32 (!%p156_p3), %s594_s29, 3 }
  0x33   : > { %s162_s4 = scalar_lea.sflag (!%p156_p3), [#allocation5], %s594_s29  ;;  %s165_s5 = scalar_lea.vmem (!%p156_p3), [#allocation4], %s307_s30 }
  0x39   : > { %438 = dma.done.wait (%p532_p6), %s162_s4, 128  }
  0x3a   : > { %440 = vsyncadd (%p532_p6), %s162_s4, 4294967168  ;;  %vm191_vm0 = vcmask 261120   ;;  %v190_v0 = vld [vmem:[%s165_s5] sm:$0xff]  ;;  %s188_s25 = sld [smem:[#allocation2]]  ;;  %s310_s7 = sshll.u32 %s510_s0, 7 }
  0x3b   : > { %v192_v1 = vsel %vm191_vm0, %v190_v0, 0.0  ;;  %s189_s6 = sld [smem:[#allocation3]]  ;;  %s187_s8 = scalar_lea.vmem [#allocation7], %s307_s30 }
  0x3c   : > { %193 = vadd.xlane.f32.xlu0 %v192_v1  ;;  %s231_s9 = sshll.u32 %s187_s8, 4  ;;  %s612_s12 = scalar_lea.hbm %s660_s3, %s310_s7  ;;  %s614_s9 = int_to_ptr.vmem [resolvable:$true] %s231_s9 }
  0x3d   : > { %s218_s13 = scalar_lea.sflag [#allocation6], %s594_s29  ;;  %s393_s14 = scalar_lea.vmem %s614_s9, 128 }
  0x3e   : > { %p394_p6 = scmp.ne.s32.totalorder %s614_s9, %s393_s14  ;;  %p669_p11 = scmp.ne.s32.totalorder %s664_s26, 0 }
  0x3f   : > { %s462_s0 = smov [#allocation7]  }
  0x40   : > { %v211_v15 = vstv %s188_s25  ;;  %p395_p12 = pnand %p394_p6, %p669_p11  ;;  %s397_s15 = sshll.u32 %s462_s0, 4  ;;  %s398_s15 = int_to_ptr.vmem [resolvable:$false] %s397_s15 }
  0x41   : > { %v214_v18 = vstv %s189_s6  ;;  %s399_s1 = scalar_lea.vmem %s398_s15, 256  ;;  %p400_p7 = scmp.lt.s32.totalorder %s614_s9, %s398_s15 }
  0x42   : > { %p396_p13 = pneg %p395_p12  ;;  %p401_p10 = scmp.lt.s32.totalorder %s399_s1, %s393_s14 }
  0x44   : > { %p402_p2 = por %p401_p10, %p400_p7 }
  0x46   : > { %p403_p4 = pnand %p402_p2, %p396_p13 }
  0xc9   : > { %v194_v2 = vpop.xlane.xlu0 %193 }
  0xca   : > { %v195_v3 = vmul.f32 0.03125, %v194_v2 }
  0xcc   : > { %v196_v4 = vsub.f32 %v190_v0, %v195_v3 }
  0xce   : > { %v197_v5 = vmul.f32 %v196_v4, %v196_v4 }
  0xd0   : > { %v198_v6 = vsel %vm191_vm0, %v197_v5, 0.0 }
  0xd1   : > { %199 = vadd.xlane.f32.xlu0 %v198_v6 }
 0x15e   : > { %v200_v7 = vpop.xlane.xlu0 %199 }
 0x15f   : > { %v201_v8 = vmul.f32 0.032258064, %v200_v7 }
 0x161   : > { %359 = vrsqrt.f32 %v201_v8  ;;  %vm204_vm1 = vcmp.eq.f32.partialorder %v201_v8, inf  ;;  %v207_v11 = vand.u32 2147483648, %v201_v8  ;;  %vm206_vm2 = vcmp.eq.f32.partialorder %v201_v8, 0.0 }
 0x16b   : > { %v360_v9 = vpop.eup %359 }
 0x16c   : > { %v203_v10 = vmul.f32 %v360_v9, %v201_v8 }
 0x16e   : > { %v205_v12 = vsel %vm204_vm1, %v201_v8, %v203_v10 }
 0x16f   : > { %v208_v13 = vsel %vm206_vm2, %v207_v11, %v205_v12 }
 0x170   : > { %v209_v14 = vadd.f32 1e-06, %v208_v13 }
 0x172   : > { %361 = vrcp.f32 %v209_v14 }
 0x17c   : > { %v362_v16 = vpop.eup %361 }
 0x17d   : > { %v212_v17 = vmul.f32 %v362_v16, %v211_v15 }
 0x17f   : > { %v213_v19 = vmul.f32 %v212_v17, %v196_v4 }
 0x181   : > { %v215_v20 = vadd.f32 %v214_v18, %v213_v19 }
 0x183   : > { %216 = vst.msk [vmem:[%s187_s8] sm:$0xff] %vm191_vm0, %v215_v20 }
 0x184   : > { %406 = shalt.err (!%p403_p4)
}
 0x185   : > { %s407_s21 = scalar_lea.hbm %s612_s12, 128  ;;  %s411_s28 = scalar_lea.hbm %s660_s3, 256 }
 0x186   : > { %p408_p5 = scmp.ne.s32.totalorder %s612_s12, %s407_s21  ;;  %p412_p0 = scmp.lt.u32.totalorder %s612_s12, %s660_s3 }
 0x187   : > { %p413_p1 = scmp.lt.u32.totalorder %s411_s28, %s407_s21  ;;  %p415_p6 = scmp.lt.u32.totalorder %s407_s21, %s612_s12 }
 0x188   : > { %p409_p8 = pnand %p408_p5, %p669_p11 }
 0x189   : > { %p414_p3 = por %p413_p1, %p412_p0 }
 0x18a   : > { %p410_p9 = pneg %p409_p8 }
 0x18b   : > { %p416_p12 = por %p415_p6, %p414_p3 }
 0x18d   : > { %p417_p13 = pnand %p416_p12, %p410_p9 }
 0x18f   : > { %420 = shalt.err (!%p417_p13)
}
 0x190   : > { %315 = dma.vmem_to_hbm [thread:$0]  (%p669_p11), %s614_s9, 128, %s612_s12, %s218_s13  }
 0x191 PF: > { %s243_s4 = sand.u32 1, %s447_s16   ;;  %p670_p7 = scmp.ne.s32.totalorder %s665_s27, 0 }
 0x192   : > { %p671_p10 = scmp.ge.s32.totalorder %s459_s19, 2  ;;  %s244_s5 = scalar_lea.sflag [#allocation6], %s243_s4 }
 0x194   : > { %p322_p2 = pnand %p671_p10, %p670_p7 }
 0x196   : > { %442 = dma.done.wait (!%p322_p2), %s244_s5, 128  }
 0x197   : > { %444 = vsyncadd (!%p322_p2), %s244_s5, 4294967168  ;;  %p18_p4 = scmp.ge.s32.totalorder %s514_s20, 4   ;;  %s672_s16 = smov %s451_s17 }
 0x198   : > { %s673_s17 = smov %s455_s18  ;;  %s674_s18 = smov %s526_s23 }
 0x199   : > { %s675_s19 = smov %s514_s20  ;;  %20 = sbr.rel (!%p18_p4) target bundleno = 8 (0x8), region = 77 }
 0x1a0   :  { %249 = vsyncpa [#allocation5], 1 }
 0x1a1   :  { %251 = vsyncpa [#allocation5 + $0x1], 1 }
 0x1a2   :  { %252 = vsyncpa [#allocation6], 1 }
 0x1a3   :  { %254 = vsyncpa [#allocation6 + $0x1], 1 }

</bundles_post_ra>
